<compile_context>
chip_gen: v7x
topology: tpu7x:2x2x1
jax: 0.10.0
libtpu: 0.0.40
codegen_flags: <defaults>
</compile_context>

<pallas_src>
import functools
import math

import jax
import jax.numpy as jnp
from jax.experimental import pallas as pl
from jax.experimental.pallas import tpu as pltpu


def make_positional_encoding(d_model: int, max_len: int = 5000) -> jnp.ndarray:
    """Deterministic pe buffer, shape [max_len, d_model, 1] (matches torch init)."""
    position = jnp.arange(max_len, dtype=jnp.float32)[:, None]                 # [L, 1]
    div_term = jnp.exp(
        jnp.arange(0, d_model, 2, dtype=jnp.float32) * (-math.log(10000.0) / d_model)
    )                                                                           # [D/2]
    pe = jnp.zeros((max_len, d_model), dtype=jnp.float32)
    pe = pe.at[:, 0::2].set(jnp.sin(position * div_term))
    pe = pe.at[:, 1::2].set(jnp.cos(position * div_term))
    return pe[:, :, None]                                                       # [L, D, 1]


# --------------------------------------------------------------------------
# Kernels.  Blocks: x/out -> (bs, N, D), pe -> (bs, 1, D).  D is the lane axis.
# --------------------------------------------------------------------------

def _pe_add_kernel(x_ref, pe_ref, o_ref):
    # Pure broadcast-add (eval mode / p == 0).  pe broadcasts over the N
    # (sublane-group) axis; no lane relayout needed.
    o_ref[...] = (x_ref[...] + pe_ref[...]).astype(o_ref.dtype)


def _pe_add_dropout_hw_kernel(seed_ref, x_ref, pe_ref, o_ref, *, keep_thresh, scale):
    # Fused add + inverted dropout using the TPU hardware PRNG.
    # Per-block stream: (seed, program_id) -> deterministic regardless of which
    # core (v7x megacore) executes the block, but the mask does depend on the
    # chosen block size.
    y = x_ref[...] + pe_ref[...]
    pltpu.prng_seed(seed_ref[0], pl.program_id(0))
    bits = pltpu.prng_random_bits(y.shape)
    if bits.dtype != jnp.uint32:            # normally already uint32; bitcast is free
        bits = pltpu.bitcast(bits, jnp.uint32)
    keep = bits >= jnp.uint32(keep_thresh)  # P(drop) = keep_thresh / 2**32 = p
    # Scalar 0.0 in the select avoids materializing a full tile of zeros.
    o_ref[...] = jnp.where(keep, y * jnp.float32(scale), 0.0).astype(o_ref.dtype)


def _pe_add_dropout_bits_kernel(x_ref, pe_ref, bits_ref, o_ref, *, keep_thresh, scale):
    # Portable fallback: random bits precomputed in the wrapper (used when the
    # backend is not a TPU, e.g. CPU interpret mode, where pltpu.prng_* does
    # not lower).
    y = x_ref[...] + pe_ref[...]
    keep = bits_ref[...] >= jnp.uint32(keep_thresh)
    o_ref[...] = jnp.where(keep, y * jnp.float32(scale), 0.0).astype(o_ref.dtype)


# --------------------------------------------------------------------------
# Wrapper
# --------------------------------------------------------------------------

def _pick_block_rows(S, N, D, itemsize, target_bytes=2 << 20):
    """~2 MiB x-blocks: big enough for ~85% of HBM roofline, small enough that
    double-buffered in+out (+bits in the fallback) fits v5e's 16 MiB scoped
    VMEM and v7x's 32 MiB scoped VMEM."""
    rows = max(1, target_bytes // max(1, N * D * itemsize))
    return int(min(S, rows))


def _block_map(i, *_):          # *_ absorbs scalar-prefetch refs when present
    return (i, 0, 0)


def positional_encoding_forward(x, pe, *, seed=0, dropout_p=0.1, training=True,
                                block_s=None):
    """x: [S, D, N]; pe: [max_len, D, 1]; returns dropout(x + pe[:S]) with the
    same shape/dtype as x.  `seed` should be fresh per call in training."""
    S, D, N = x.shape

    # torch.nn.Dropout(p=1.0) zeroes everything; avoid uint32 threshold overflow.
    if training and dropout_p >= 1.0:
        return jnp.zeros_like(x)

    # Lane-dense relayout: [S, D, N] -> [S, N, D] so d_model sits on the lane axis.
    xt = jnp.swapaxes(x, 1, 2)                         # [S, N, D]
    pe_s = jnp.transpose(pe[:S], (0, 2, 1))            # [S, 1, D]  (un-materialized over N)

    if block_s is None:
        block_s = _pick_block_rows(S, N, D, jnp.dtype(x.dtype).itemsize)
    grid = (pl.cdiv(S, block_s),)

    x_spec = pl.BlockSpec((block_s, N, D), _block_map)
    pe_spec = pl.BlockSpec((block_s, 1, D), _block_map)
    out_spec = pl.BlockSpec((block_s, N, D), _block_map)
    out_shape = jax.ShapeDtypeStruct((S, N, D), x.dtype)
    cparams = pltpu.CompilerParams(dimension_semantics=("parallel",))

    apply_dropout = bool(training) and float(dropout_p) > 0.0

    if not apply_dropout:
        # TODO(synk): in pure eval mode XLA's fused broadcast-add is already
        # near-roofline; the Pallas path is kept for a single code path.
        yt = pl.pallas_call(
            _pe_add_kernel,
            out_shape=out_shape,
            grid_spec=pltpu.PrefetchScalarGridSpec(
                num_scalar_prefetch=0, grid=grid,
                in_specs=[x_spec, pe_spec], out_specs=out_spec),
            compiler_params=cparams,
        )(xt, pe_s)
    else:
        p = float(dropout_p)
        keep_thresh = min(int(p * 4294967296.0), 4294967295)   # P(bits < thresh) = p
        scale = 1.0 / (1.0 - p)
        if jax.default_backend() == "tpu":
            # Hardware PRNG: dropout mask generated on-chip, no extra HBM traffic.
            kernel = functools.partial(_pe_add_dropout_hw_kernel,
                                       keep_thresh=keep_thresh, scale=scale)
            seed_arr = jnp.asarray([seed], dtype=jnp.int32)
            yt = pl.pallas_call(
                kernel,
                out_shape=out_shape,
                grid_spec=pltpu.PrefetchScalarGridSpec(
                    num_scalar_prefetch=1,            # seed lands in SMEM
                    grid=grid,
                    in_specs=[x_spec, pe_spec], out_specs=out_spec),
                compiler_params=cparams,
            )(seed_arr, xt, pe_s)
        else:
            # TODO(synk): pltpu.prng_* has no CPU/interpret lowering; stream
            # precomputed random bits instead (distribution-equivalent dropout).
            bits = jax.random.bits(jax.random.PRNGKey(seed), (S, N, D),
                                   dtype=jnp.uint32)
            kernel = functools.partial(_pe_add_dropout_bits_kernel,
                                       keep_thresh=keep_thresh, scale=scale)
            yt = pl.pallas_call(
                kernel,
                out_shape=out_shape,
                grid_spec=pltpu.PrefetchScalarGridSpec(
                    num_scalar_prefetch=0, grid=grid,
                    in_specs=[x_spec, pe_spec, x_spec], out_specs=out_spec),
                compiler_params=cparams,
            )(xt, pe_s, bits)

    return jnp.swapaxes(yt, 1, 2)                      # back to [S, D, N]


if __name__ == "__main__":
    S, D, N = 8, 32, 16          # seq_len, d_model, trailing (broadcast) dim
    MAX_LEN = 64

    key = jax.random.PRNGKey(0)
    x = jax.random.normal(key, (S, D, N), dtype=jnp.float32)
    pe = make_positional_encoding(D, MAX_LEN)
    ref = x + pe[:S]             # broadcast [S, D, 1] over N

    # Eval-mode pass (dropout = identity): exact semantics of x + pe[:S].
    out_eval = jax.block_until_ready(
        positional_encoding_forward(x, pe, dropout_p=0.1, training=False))
    assert out_eval.shape == (S, D, N)
    assert jnp.allclose(out_eval, ref, atol=1e-6, rtol=1e-6)

    # Training-mode pass (inverted dropout, p = 0.1).
    p = 0.1
    out_train = jax.block_until_ready(
        positional_encoding_forward(x, pe, seed=1234, dropout_p=p, training=True))
    assert out_train.shape == (S, D, N)
    scale = 1.0 / (1.0 - p)
    kept_ok = jnp.isclose(out_train, ref * scale, rtol=1e-5, atol=1e-5)
    dropped = out_train == 0.0
    assert bool(jnp.all(kept_ok | dropped))                 # every elem kept*scale or zeroed
    frac = float(jnp.mean(dropped.astype(jnp.float32)))
    assert 0.02 < frac < 0.30, f"unexpected drop fraction {frac}"

    print("KERNEL_OK")
</pallas_src>

<mosaic_0001>
module attributes {stable_mosaic.version = 11 : i64} {
  func.func @_pe_add_kernel(%arg0: i32, %arg1: memref<8x16x32xf32, #tpu.memory_space<vmem>>, %arg2: memref<8x1x32xf32, #tpu.memory_space<vmem>>, %arg3: memref<8x16x32xf32, #tpu.memory_space<vmem>>) attributes {dimension_semantics = [#tpu.dimension_semantics<parallel>], iteration_bounds = array<i64: 1>, scalar_prefetch = 0 : i64, scratch_operands = 0 : i64, tpu.core_type = #tpu.core_type<tc>, window_params = [{transform_indices = @transform_0, window_bounds = array<i64: 8, 16, 32>}, {transform_indices = @transform_1, window_bounds = array<i64: 8, 1, 32>}, {transform_indices = @transform_2, window_bounds = array<i64: 8, 16, 32>}]} {
    %c0 = arith.constant 0 : index
    %c0_0 = arith.constant 0 : index
    %c0_1 = arith.constant 0 : index
    %0 = vector.load %arg1[%c0, %c0_0, %c0_1] : memref<8x16x32xf32, #tpu.memory_space<vmem>>, vector<8x16x32xf32>
    %c0_2 = arith.constant 0 : index
    %c0_3 = arith.constant 0 : index
    %c0_4 = arith.constant 0 : index
    %1 = vector.load %arg2[%c0_2, %c0_3, %c0_4] : memref<8x1x32xf32, #tpu.memory_space<vmem>>, vector<8x1x32xf32>
    %2 = vector.broadcast %1 : vector<8x1x32xf32> to vector<8x16x32xf32>
    %3 = arith.addf %0, %2 : vector<8x16x32xf32>
    %c0_5 = arith.constant 0 : index
    %c0_6 = arith.constant 0 : index
    %c0_7 = arith.constant 0 : index
    %4 = vector.load %arg3[%c0_5, %c0_6, %c0_7] : memref<8x16x32xf32, #tpu.memory_space<vmem>>, vector<8x16x32xf32>
    tpu.vector_store %arg3[%c0_5, %c0_6, %c0_7], %3 {strides = array<i32>} : memref<8x16x32xf32, #tpu.memory_space<vmem>>, vector<8x16x32xf32>,
    return
  }
  func.func @transform_0(%arg0: i32) -> (i32, i32, i32) {
    %c0_i32 = arith.constant 0 : i32
    %c0_i32_0 = arith.constant 0 : i32
    %c0_i32_1 = arith.constant 0 : i32
    return %arg0, %c0_i32, %c0_i32_0 : i32, i32, i32
  }
  func.func @transform_1(%arg0: i32) -> (i32, i32, i32) {
    %c0_i32 = arith.constant 0 : i32
    %c0_i32_0 = arith.constant 0 : i32
    %c0_i32_1 = arith.constant 0 : i32
    return %arg0, %c0_i32, %c0_i32_0 : i32, i32, i32
  }
  func.func @transform_2(%arg0: i32) -> (i32, i32, i32) {
    %c0_i32 = arith.constant 0 : i32
    %c0_i32_0 = arith.constant 0 : i32
    %c0_i32_1 = arith.constant 0 : i32
    return %arg0, %c0_i32, %c0_i32_0 : i32, i32, i32
  }
}

</mosaic_0001>

<bundles_post_ra>
// kernel: tpu_custom_call.1
= control target key start
LH: loop header
LB: loop body
LE: loop exit
PB: predicated region body
PF: predicated region fallthrough
CT: control target
= control target key end

     0   :  { %7 = vsyncpa [#allocation3], 0  ;;  %s330_s0 = inlined_call_operand.hbm [shape: f32[8,16,32], index: 0, kind: input, shape index: {}]   ;;  %s331_s1 = inlined_call_operand.hbm [shape: f32[8,1,32], index: 1, kind: input, shape index: {}]   ;;  %s332_s2 = inlined_call_operand.hbm [shape: f32[8,16,32], index: 2, kind: output, shape index: {}]  }
   0x1   :  { %8 = vsyncpa [#allocation6], 0 }
   0x2   :  { %9 = vsyncpa [#allocation4], 0  ;;  %s250_s9 = smov [#allocation2]   ;;  %s178_s13 = scalar_lea.hbm %s330_s0, 2048 }
   0x3   :  { %s15_s10 = sshll.u32 %s250_s9, 4  ;;  %p179_p0 = scmp.ne.s32.totalorder %s330_s0, %s178_s13  ;;  %s16_s10 = int_to_ptr.vmem [resolvable:$true] %s15_s10 }
   0x4   :  { %p182_p1 = scmp.lt.u32.totalorder %s178_s13, %s330_s0 }
   0x6   :  { %p184_p2 = pnand %p182_p1, %p179_p0 }
   0x8   :  { %187 = shalt.err (!%p184_p2)
}
   0x9   :  { %s188_s18 = scalar_lea.vmem %s16_s10, 2048  ;;  %p193_p4 = scmp.lt.s32.totalorder %s16_s10, %s16_s10 }
   0xa   :  { %p189_p3 = scmp.ne.s32.totalorder %s16_s10, %s188_s18  ;;  %p194_p5 = scmp.lt.s32.totalorder %s188_s18, %s188_s18 }
   0xc   :  { %p195_p6 = por %p194_p5, %p193_p4 }
   0xe   :  { %p196_p7 = pnand %p195_p6, %p189_p3 }
  0x10   :  { %199 = shalt.err (!%p196_p7)
}
  0x11   :  { %s251_s19 = smov 128   ;;  %s252_s20 = smov 8  }
  0x12   :  { %21 = dma.hbm_to_vmem [thread:$0]  %s330_s0, 2048, %s16_s10, [#allocation3], %s251_s19, %s251_s19, %s252_s20  }
  0x13   :  { %s253_s23 = smov [#allocation5]   ;;  %s200_s27 = scalar_lea.hbm %s331_s1, 128 }
  0x14   :  { %s27_s24 = sshll.u32 %s253_s23, 4  ;;  %p201_p8 = scmp.ne.s32.totalorder %s331_s1, %s200_s27  ;;  %s28_s24 = int_to_ptr.vmem [resolvable:$true] %s27_s24 }
  0x15   :  { %p204_p9 = scmp.lt.u32.totalorder %s200_s27, %s331_s1 }
  0x17   :  { %p206_p10 = pnand %p204_p9, %p201_p8 }
  0x19   :  { %209 = shalt.err (!%p206_p10)
}
  0x1a   :  { %s210_s4 = scalar_lea.vmem %s28_s24, 128  ;;  %p215_p12 = scmp.lt.s32.totalorder %s28_s24, %s28_s24 }
  0x1b   :  { %p211_p11 = scmp.ne.s32.totalorder %s28_s24, %s210_s4  ;;  %p216_p13 = scmp.lt.s32.totalorder %s210_s4, %s210_s4 }
  0x1d   :  { %p217_p0 = por %p216_p13, %p215_p12 }
  0x1f   :  { %p218_p1 = pnand %p217_p0, %p211_p11 }
  0x21   :  { %221 = shalt.err (!%p218_p1)
}
  0x22   :  { %s254_s0 = smov 16   ;;  %s255_s5 = smov 1  }
  0x23   :  { %33 = dma.hbm_to_vmem [thread:$0]  %s331_s1, 128, %s28_s24, [#allocation6], %s254_s0, %s254_s0, %s255_s5  }
  0x24   :  { %244 = dma.done.wait [#allocation3], 2048  }
  0x25   :  { %245 = vsyncadd [#allocation3], 4294965248 }
  0x26   :  { %246 = dma.done.wait [#allocation6], 128  }
  0x27   :  { %247 = vsyncadd [#allocation6], 4294967168  ;;  %v40_v0 = vld [vmem:[#allocation2] sm:$0xff]  ;;  %vm128_vm0 = vcmask 261120   ;;  %v41_v2 = vld [vmem:[#allocation2 + $0x8] sm:$0xff]  ;;  %s256_s1 = smov [#allocation7]  }
  0x28   :  { %v163_v1 = vld [vmem:[#allocation5] ss:$0 sm:$0xff]  ;;  %v42_v5 = vld [vmem:[#allocation2 + $0x10] sm:$0xff]  ;;  %v164_v6 = vld [vmem:[#allocation5 + $0x1] ss:$0 sm:$0xff]  ;;  %s150_s8 = sshll.u32 %s256_s1, 4  ;;  %s151_s8 = int_to_ptr.vmem [resolvable:$true] %s150_s8 }
  0x29   :  { %v112_v3 = vadd.f32 %v163_v1, %v40_v0  ;;  %v113_v4 = vadd.f32 %v163_v1, %v41_v2  ;;  %v43_v7 = vld [vmem:[#allocation2 + $0x18] sm:$0xff]  ;;  %v114_v8 = vadd.f32 %v164_v6, %v42_v5  ;;  %v44_v10 = vld [vmem:[#allocation2 + $0x20] sm:$0xff]  ;;  %v45_v12 = vld [vmem:[#allocation2 + $0x28] sm:$0xff]  ;;  %s222_s9 = scalar_lea.vmem %s151_s8, 2048  ;;  %p227_p3 = scmp.lt.s32.totalorder %s151_s8, %s151_s8 }
  0x2a   :  { %v115_v9 = vadd.f32 %v164_v6, %v43_v7  ;;  %v165_v11 = vld [vmem:[#allocation5 + $0x2] ss:$0 sm:$0xff]  ;;  %v46_v15 = vld [vmem:[#allocation2 + $0x30] sm:$0xff]  ;;  %v166_v16 = vld [vmem:[#allocation5 + $0x3] ss:$0 sm:$0xff]  ;;  %p223_p2 = scmp.ne.s32.totalorder %s151_s8, %s222_s9  ;;  %p228_p4 = scmp.lt.s32.totalorder %s222_s9, %s222_s9 }
  0x2b   :  { %129 = vst.msk [vmem:[#allocation7] sm:$0xff] %vm128_vm0, %v112_v3  ;;  %130 = vst.msk [vmem:[#allocation7 + $0x8] sm:$0xff] %vm128_vm0, %v113_v4  ;;  %v116_v13 = vadd.f32 %v165_v11, %v44_v10  ;;  %v117_v14 = vadd.f32 %v165_v11, %v45_v12  ;;  %v47_v17 = vld [vmem:[#allocation2 + $0x38] sm:$0xff]  ;;  %v118_v18 = vadd.f32 %v166_v16, %v46_v15  ;;  %v48_v20 = vld [vmem:[#allocation2 + $0x40] sm:$0xff] }
  0x2c   :  { %131 = vst.msk [vmem:[#allocation7 + $0x10] sm:$0xff] %vm128_vm0, %v114_v8  ;;  %132 = vst.msk [vmem:[#allocation7 + $0x18] sm:$0xff] %vm128_vm0, %v115_v9  ;;  %v119_v19 = vadd.f32 %v166_v16, %v47_v17  ;;  %v167_v21 = vld [vmem:[#allocation5 + $0x4] ss:$0 sm:$0xff]  ;;  %v49_v22 = vld [vmem:[#allocation2 + $0x48] sm:$0xff]  ;;  %p229_p5 = por %p228_p4, %p227_p3 }
  0x2d   :  { %133 = vst.msk [vmem:[#allocation7 + $0x20] sm:$0xff] %vm128_vm0, %v116_v13  ;;  %134 = vst.msk [vmem:[#allocation7 + $0x28] sm:$0xff] %vm128_vm0, %v117_v14  ;;  %v120_v23 = vadd.f32 %v167_v21, %v48_v20  ;;  %v121_v24 = vadd.f32 %v167_v21, %v49_v22  ;;  %v50_v25 = vld [vmem:[#allocation2 + $0x50] sm:$0xff]  ;;  %v168_v26 = vld [vmem:[#allocation5 + $0x5] ss:$0 sm:$0xff] }
  0x2e   :  { %v51_v27 = vld [vmem:[#allocation2 + $0x58] sm:$0xff]  ;;  %135 = vst.msk [vmem:[#allocation7 + $0x30] sm:$0xff] %vm128_vm0, %v118_v18  ;;  %136 = vst.msk [vmem:[#allocation7 + $0x38] sm:$0xff] %vm128_vm0, %v119_v19  ;;  %v122_v28 = vadd.f32 %v168_v26, %v50_v25  ;;  %v52_v30 = vld [vmem:[#allocation2 + $0x60] sm:$0xff]  ;;  %p230_p6 = pnand %p229_p5, %p223_p2 }
  0x2f   :  { %v123_v29 = vadd.f32 %v168_v26, %v51_v27  ;;  %v169_v31 = vld [vmem:[#allocation5 + $0x6] ss:$0 sm:$0xff]  ;;  %v53_v32 = vld [vmem:[#allocation2 + $0x68] sm:$0xff]  ;;  %137 = vst.msk [vmem:[#allocation7 + $0x40] sm:$0xff] %vm128_vm0, %v120_v23  ;;  %138 = vst.msk [vmem:[#allocation7 + $0x48] sm:$0xff] %vm128_vm0, %v121_v24 }
  0x30   :  { %v124_v33 = vadd.f32 %v169_v31, %v52_v30  ;;  %v125_v34 = vadd.f32 %v169_v31, %v53_v32  ;;  %v54_v35 = vld [vmem:[#allocation2 + $0x70] sm:$0xff]  ;;  %v170_v36 = vld [vmem:[#allocation5 + $0x7] ss:$0 sm:$0xff]  ;;  %v55_v37 = vld [vmem:[#allocation2 + $0x78] sm:$0xff]  ;;  %139 = vst.msk [vmem:[#allocation7 + $0x50] sm:$0xff] %vm128_vm0, %v122_v28 }
  0x31   :  { %140 = vst.msk [vmem:[#allocation7 + $0x58] sm:$0xff] %vm128_vm0, %v123_v29  ;;  %v126_v38 = vadd.f32 %v170_v36, %v54_v35  ;;  %v127_v39 = vadd.f32 %v170_v36, %v55_v37 }
  0x32   :  { %141 = vst.msk [vmem:[#allocation7 + $0x60] sm:$0xff] %vm128_vm0, %v124_v33  ;;  %142 = vst.msk [vmem:[#allocation7 + $0x68] sm:$0xff] %vm128_vm0, %v125_v34 }
  0x33   :  { %143 = vst.msk [vmem:[#allocation7 + $0x70] sm:$0xff] %vm128_vm0, %v126_v38  ;;  %144 = vst.msk [vmem:[#allocation7 + $0x78] sm:$0xff] %vm128_vm0, %v127_v39 }
  0x34   :  { %233 = shalt.err (!%p230_p6)
}
  0x35   :  { %s234_s12 = scalar_lea.hbm %s332_s2, 2048 }
  0x36   :  { %p235_p7 = scmp.ne.s32.totalorder %s332_s2, %s234_s12  ;;  %p238_p8 = scmp.lt.u32.totalorder %s234_s12, %s332_s2 }
  0x38   :  { %p240_p9 = pnand %p238_p8, %p235_p7 }
  0x3a   :  { %243 = shalt.err (!%p240_p9)
}
  0x3b   :  { %156 = dma.vmem_to_hbm [thread:$0]  %s151_s8, 2048, %s332_s2, [#allocation4], %s251_s19, %s251_s19, %s252_s20  }
  0x3c   :  { %248 = dma.done.wait [#allocation4], 2048  }
  0x3d   :  { %249 = vsyncadd [#allocation4], 4294965248 }
  0x3e   :  { %160 = vsyncpa [#allocation3], 1 }
  0x3f   :  { %161 = vsyncpa [#allocation6], 1 }
  0x40   :  { %162 = vsyncpa [#allocation4], 1 }

</bundles_post_ra>
